<compile_context>
chip_gen: v7x
topology: tpu7x:2x2x1
jax: 0.10.0
libtpu: 0.0.40
codegen_flags: <defaults>
</compile_context>

<pallas_src>
import functools

import jax
import jax.numpy as jnp
from jax.experimental import pallas as pl
from jax.experimental.pallas import tpu as pltpu


_BUFFER_PAYLOAD_BYTES = 4 << 20          # ~4 MiB payload per block buffer
_VMEM_LIMIT_BYTES = 32 * 1024 * 1024     # in+out double-buffered <= ~16 MiB; safe on v5e/v6e/v7x


def _round_up(x: int, m: int) -> int:
    return ((x + m - 1) // m) * m


def _pad_copy_kernel(x_ref, o_ref, *, blk, valid, value):
    """Copy one tile of the padded output.

    The tiled axis is dim 1 of the block for both layouts:
      2-D blocks: (B_tile, col_tile)       -> dim 1 = flat columns (lane axis)
      3-D blocks: (B_tile, row_tile, 128)  -> dim 1 = 128-wide rows (sublane axis)
    Positions whose global dim-1 index >= `valid` are padding and get `value`;
    all other positions are an identity copy of the input block (whose
    index_map is clamped so every in-range position aliases correct data).
    """
    start = pl.program_id(1) * blk
    fill = jnp.asarray(value, dtype=o_ref.dtype)

    @pl.when(start + blk <= valid)
    def _interior():                      # whole tile is valid data: pure copy
        o_ref[...] = x_ref[...]

    @pl.when(start + blk > valid)
    def _boundary():                      # tail tile: masked copy / constant fill
        idx = start + jax.lax.broadcasted_iota(jnp.int32, o_ref.shape, 1)
        o_ref[...] = jnp.where(idx < valid, x_ref[...], fill)


def reduction_fold(inputs, factor: int, value: float = 0.0):
    """Fold [B, T, C] -> [B, ceil(T/F), F*C], padding the tail rows with `value`.

    Mirrors Reduction.forward: returns (folded, remains); remains is None when
    T is already a multiple of `factor`.
    """
    b, t, c = inputs.shape
    rem = (-t) % factor

    # Aligned fast path: the fold is a free contiguous reshape; no kernel.
    if rem == 0:
        return inputs.reshape(b, t // factor, factor * c), None

    t_pad = t + rem
    flat_in = t * c                        # valid flat columns per batch row
    flat_out = t_pad * c
    itemsize = jnp.dtype(inputs.dtype).itemsize
    g = max(8, 32 // itemsize)             # sublane granularity: f32->8, bf16->16, int8->32

    if flat_in % 128 == 0 and flat_out % 128 == 0 and flat_out // 128 >= g:
        # ---- dense layout: view each batch row as [rows, 128] ----------------
        n_in_rows = flat_in // 128
        n_out_rows = flat_out // 128
        row_bytes = 128 * itemsize

        if b * g * row_bytes <= _BUFFER_PAYLOAD_BYTES:
            tb = b
            blk = (_BUFFER_PAYLOAD_BYTES // (b * row_bytes)) // g * g
        else:                              # huge batch: tile B as well
            tb = max(g, (_BUFFER_PAYLOAD_BYTES // (g * row_bytes)) // g * g)
            blk = g
        blk = min(blk, (n_out_rows // g) * g)        # never exceed the output extent
        nb = pl.cdiv(b, tb)
        if nb == 1 and n_out_rows > g:               # >= 2 parallel steps (v7x: 2 TCs)
            blk = min(blk, _round_up(pl.cdiv(n_out_rows, 2), g))
        nj = pl.cdiv(n_out_rows, blk)
        n_in_blocks = max(1, pl.cdiv(n_in_rows, blk))

        x_view = inputs.reshape(b, n_in_rows, 128)   # free contiguous view
        out_shape = jax.ShapeDtypeStruct((b, n_out_rows, 128), inputs.dtype)
        in_spec = pl.BlockSpec(
            (tb, blk, 128), lambda i, j: (i, jnp.minimum(j, n_in_blocks - 1), 0))
        out_spec = pl.BlockSpec((tb, blk, 128), lambda i, j: (i, j, 0))
        valid = n_in_rows
    else:
        # ---- generic fallback: flat per-batch columns, lane-dense tiles ------
        # (sublane axis = B may be padded up to g; the budget accounts for it)
        if b * 128 * itemsize <= _BUFFER_PAYLOAD_BYTES:
            tb = b
            blk = (_BUFFER_PAYLOAD_BYTES // (max(b, g) * itemsize)) // 128 * 128
        else:                              # huge batch: tile B as well
            tb = max(g, (_BUFFER_PAYLOAD_BYTES // (128 * itemsize)) // g * g)
            blk = 128
        blk = max(128, min(blk, pl.cdiv(flat_out, 128) * 128))
        nb = pl.cdiv(b, tb)
        if nb == 1 and flat_out > 128:               # >= 2 parallel steps (v7x: 2 TCs)
            blk = max(128, min(blk, _round_up(pl.cdiv(flat_out, 2), 128)))
        nj = pl.cdiv(flat_out, blk)
        n_in_blocks = max(1, pl.cdiv(flat_in, blk))

        x_view = inputs.reshape(b, flat_in)          # free contiguous view
        out_shape = jax.ShapeDtypeStruct((b, flat_out), inputs.dtype)
        in_spec = pl.BlockSpec(
            (tb, blk), lambda i, j: (i, jnp.minimum(j, n_in_blocks - 1)))
        out_spec = pl.BlockSpec((tb, blk), lambda i, j: (i, j))
        valid = flat_in

    padded = pl.pallas_call(
        functools.partial(_pad_copy_kernel, blk=blk, valid=valid, value=value),
        out_shape=out_shape,
        grid=(nb, nj),
        in_specs=[in_spec],
        out_specs=out_spec,
        compiler_params=pltpu.CompilerParams(
            dimension_semantics=("parallel", "parallel"),
            vmem_limit_bytes=_VMEM_LIMIT_BYTES),
        cost_estimate=pl.CostEstimate(
            flops=0, transcendentals=0,
            bytes_accessed=b * (flat_in + flat_out) * itemsize),
    )(x_view)

    folded = padded.reshape(b, t_pad // factor, factor * c)   # free contiguous view
    return folded, rem
    # TODO(synk): Reduction.unfold (inverse op) is pure reshape/slice glue and is
    # not part of forward; not implemented as a kernel.


if __name__ == "__main__":
    key = jax.random.PRNGKey(0)
    keys = jax.random.split(key, 4)

    def ref_fold(x, factor, value):
        b, t, c = x.shape
        rem = (-t) % factor
        t_pad = t + rem
        xp = jnp.pad(x, ((0, 0), (0, rem), (0, 0)), constant_values=value)
        return xp.reshape(b, t_pad // factor, factor * c), (rem if rem > 0 else None)

    def check(x, factor, value):
        got, got_rem = reduction_fold(x, factor, value)
        got = jax.block_until_ready(got)
        want, want_rem = ref_fold(x, factor, value)
        assert got.shape == want.shape, (got.shape, want.shape)
        assert got.dtype == x.dtype
        assert got_rem == want_rem, (got_rem, want_rem)
        assert jnp.array_equal(got, want), "mismatch vs reference"

    # 1) generic fallback path (flat columns not 128-aligned): multi-tile,
    #    interior copy + boundary mask + clamped partial input read.
    check(jax.random.normal(keys[0], (2, 9, 32), dtype=jnp.float32), 2, 0.0)

    # 2) tiny input: single block wider than both flat extents, non-zero pad value.
    check(jax.random.normal(keys[1], (2, 3, 16), dtype=jnp.float32), 2, -1.5)

    # 3) dense 3-D path (128-aligned flat extents), f32: interior + boundary tiles.
    check(jax.random.normal(keys[2], (2, 13, 128), dtype=jnp.float32), 4, 0.5)

    # 4) dense 3-D path, bf16 (16-row sublane granularity).
    check(jax.random.normal(keys[3], (2, 17, 128), dtype=jnp.bfloat16), 4, 0.0)

    # 5) aligned fast path: no kernel, pure reshape, remains is None.
    x_al = jax.random.normal(keys[0], (2, 8, 32), dtype=jnp.float32)
    f_al, r_al = reduction_fold(x_al, 2, 0.0)
    f_al = jax.block_until_ready(f_al)
    assert r_al is None
    assert jnp.array_equal(f_al, x_al.reshape(2, 4, 2 * 32))

    print("KERNEL_OK")
</pallas_src>

<mosaic_0001>
module attributes {stable_mosaic.version = 11 : i64} {
  func.func @_pad_copy_kernel(%arg0: i32, %arg1: i32, %arg2: memref<2x256xf32, #tpu.memory_space<vmem>>, %arg3: memref<2x256xf32, #tpu.memory_space<vmem>>) attributes {dimension_semantics = [#tpu.dimension_semantics<parallel>, #tpu.dimension_semantics<parallel>], iteration_bounds = array<i64: 1, 2>, scalar_prefetch = 0 : i64, scratch_operands = 0 : i64, tpu.core_type = #tpu.core_type<tc>, window_params = [{transform_indices = @transform_0, window_bounds = array<i64: 2, 256>}, {transform_indices = @transform_1, window_bounds = array<i64: 2, 256>}]} {
    %c256_i32 = arith.constant 256 : i32
    %0 = arith.muli %arg1, %c256_i32 : i32
    %c256_i32_0 = arith.constant 256 : i32
    %1 = arith.addi %0, %c256_i32_0 : i32
    %c288_i32 = arith.constant 288 : i32
    %2 = arith.cmpi sle, %1, %c288_i32 : i32
    %3 = arith.extui %2 : i1 to i32
    %c0_i32 = arith.constant 0 : i32
    %4 = arith.cmpi ne, %3, %c0_i32 : i32
    scf.if %4 {
      %c0 = arith.constant 0 : index
      %c0_4 = arith.constant 0 : index
      %9 = vector.load %arg2[%c0, %c0_4] : memref<2x256xf32, #tpu.memory_space<vmem>>, vector<2x256xf32>
      %c0_5 = arith.constant 0 : index
      %c0_6 = arith.constant 0 : index
      %10 = vector.load %arg3[%c0_5, %c0_6] : memref<2x256xf32, #tpu.memory_space<vmem>>, vector<2x256xf32>
      tpu.vector_store %arg3[%c0_5, %c0_6], %9 {strides = array<i32>} : memref<2x256xf32, #tpu.memory_space<vmem>>, vector<2x256xf32>,
    } else {
    }
    %c256_i32_1 = arith.constant 256 : i32
    %5 = arith.addi %0, %c256_i32_1 : i32
    %c288_i32_2 = arith.constant 288 : i32
    %6 = arith.cmpi sgt, %5, %c288_i32_2 : i32
    %7 = arith.extui %6 : i1 to i32
    %cst = arith.constant 0.000000e+00 : f32
    %c0_i32_3 = arith.constant 0 : i32
    %8 = arith.cmpi ne, %7, %c0_i32_3 : i32
    scf.if %8 {
      %9 = tpu.iota {dimensions = array<i32: 1>} : vector<2x256xi32>
      %10 = vector.broadcast %0 : i32 to vector<2x256xi32>
      %11 = arith.addi %10, %9 : vector<2x256xi32>
      %c288_i32_4 = arith.constant 288 : i32
      %12 = vector.broadcast %c288_i32_4 : i32 to vector<2x256xi32>
      %13 = arith.cmpi slt, %11, %12 : vector<2x256xi32>
      %c0 = arith.constant 0 : index
      %c0_5 = arith.constant 0 : index
      %14 = vector.load %arg2[%c0, %c0_5] : memref<2x256xf32, #tpu.memory_space<vmem>>, vector<2x256xf32>
      %15 = vector.broadcast %cst : f32 to vector<2x256xf32>
      %16 = arith.select %13, %14, %15 : vector<2x256xi1>, vector<2x256xf32>
      %c0_6 = arith.constant 0 : index
      %c0_7 = arith.constant 0 : index
      %17 = vector.load %arg3[%c0_6, %c0_7] : memref<2x256xf32, #tpu.memory_space<vmem>>, vector<2x256xf32>
      tpu.vector_store %arg3[%c0_6, %c0_7], %16 {strides = array<i32>} : memref<2x256xf32, #tpu.memory_space<vmem>>, vector<2x256xf32>,
    } else {
    }
    return
  }
  func.func @transform_0(%arg0: i32, %arg1: i32) -> (i32, i32) {
    %c1_i32 = arith.constant 1 : i32
    %0 = arith.minsi %arg1, %c1_i32 : i32
    %c0_i32 = arith.constant 0 : i32
    return %arg0, %0 : i32, i32
  }
  func.func @transform_1(%arg0: i32, %arg1: i32) -> (i32, i32) {
    %c0_i32 = arith.constant 0 : i32
    return %arg0, %arg1 : i32, i32
  }
}

</mosaic_0001>

<bundles_post_ra>
// kernel: tpu_custom_call.1
= control target key start
LH: loop header
LB: loop body
LE: loop exit
PB: predicated region body
PF: predicated region fallthrough
CT: control target
= control target key end

     0   :  { %6 = vsyncpa [#allocation3], 0  ;;  %s798_s0 = inlined_call_operand.hbm [shape: f32[2,288], index: 0, kind: input, shape index: {}]   ;;  %s799_s1 = inlined_call_operand.hbm [shape: f32[2,320], index: 1, kind: output, shape index: {}]  }
   0x1   :  { %8 = vsyncpa [#allocation3 + $0x1], 0 }
   0x2   :  { %9 = vsyncpa [#allocation4], 0 }
   0x3   :  { %11 = vsyncpa [#allocation4 + $0x1], 0  ;;  %s585_s6 = smov 0   ;;  %s587_s7 = smov 0  }
   0x4   :  { %s589_s8 = smov 0   ;;  %s591_s9 = smov 0  }
   0x5   :  { %s593_s10 = smov 0   ;;  %s595_s11 = smov 0  }
   0x6   :  { %s597_s12 = smov 0   ;;  %s599_s13 = smov 0  }
   0x7   :  { %s601_s14 = smov 0  }
   0x8 LB: > { %s328_s15 = sadd.s32 4294967295, %s571_s14   ;;  %s329_s16 = sadd.s32 4294967294, %s571_s14   ;;  %s571_s14 = sphi %s601_s14, %s17_s14   ;;  %s567_s13 = sphi %s599_s13, %s817_s13   ;;  %s563_s12 = sphi %s597_s12, %s816_s12   ;;  %s559_s11 = sphi %s595_s11, %s815_s11   ;;  %s555_s10 = sphi %s593_s10, %s814_s10   ;;  %s551_s9 = sphi %s591_s9, %s813_s9   ;;  %s547_s8 = sphi %s589_s8, %s812_s8   ;;  %s543_s7 = sphi %s587_s7, %s811_s7   ;;  %s539_s6 = sphi %s585_s6, %s810_s6  }
   0x9   : > { %s26_s17 = sadd.s32 1, %s567_s13  ;;  %p33_p0 = scmp.lt.s32.totalorder %s567_s13, 1 }
   0xa   : > { %p27_p1 = scmp.ge.s32.totalorder %s26_s17, 2  ;;  %s42_s18 = sadd.s32 1, %s559_s11 }
   0xb   : > { %s634_s19 = scalar_select %p33_p0, %s567_s13, 1 }
   0xc   : > { %s819_s17 = smov (%p27_p1, %s26_s17), 0  ;;  %p49_p2 = scmp.ne.s32.totalorder %s559_s11, %s555_s10 }
   0xd   : > { %p50_p3 = scmp.eq.s32.totalorder %s571_s14, 0  ;;  %p35_p4 = scmp.lt.s32.totalorder %s819_s17, 1 }
   0xe   : > { %p55_p5 = scmp.ne.s32.totalorder %s555_s10, %s551_s9  ;;  %p56_p7 = scmp.eq.s32.totalorder %s328_s15, 0 }
   0xf   : > { %p643_p6 = por %p50_p3, %p49_p2  ;;  %s66_s23 = ssub.s32 %s567_s13, %s819_s17 }
  0x10   : > { %s36_s21 = scalar_select %p35_p4, %s819_s17, 1 }
  0x11   : > { %p648_p8 = por %p56_p7, %p55_p5  ;;  %p68_p9 = scmp.eq.s32.totalorder %s66_s23, 0 }
  0x12   : > { %s38_s24 = ssub.s32 %s634_s19, %s36_s21  ;;  %s70_s25 = sadd.s32 1, %s547_s8 }
  0x13   : > { %s803_s22 = scalar_select %p648_p8, 1, 0 }
  0x14   : > { %p40_p10 = scmp.eq.s32.totalorder %s38_s24, 0  ;;  %p80_p11 = scmp.ne.s32.totalorder %s547_s8, %s543_s7 }
  0x15   : > { %s657_s26 = scalar_select %p68_p9, %s547_s8, %s70_s25  }
  0x16   : > { %s660_s27 = scalar_select %p40_p10, %s559_s11, %s42_s18  }
  0x17   : > { %p81_p12 = scmp.eq.s32.totalorder %s328_s15, 1  ;;  %p86_p13 = scmp.ne.s32.totalorder %s543_s7, %s539_s6 }
  0x18   : > { %p87_p0 = scmp.eq.s32.totalorder %s329_s16, 1  ;;  %p800_p3 = scmp.ge.s32.totalorder %s571_s14, 2 }
  0x19   : > { %p666_p1 = por %p81_p12, %p80_p11 }
  0x1a   : > { %p670_p2 = por %p87_p0, %p86_p13  ;;  %103 = sbr.rel (%p800_p3) target bundleno = 67 (0x43), region = 16 }
  0x1b   : > { %s804_s28 = scalar_select %p666_p1, 1, 0 }
  0x1c   : > { %s805_s29 = scalar_select %p670_p2, 1, 0 }
  0x21   : > { %106 = sbr.rel (!%p643_p6) target bundleno = 67 (0x43), region = 20  ;;  %s107_s30 = sand.u32 (%p643_p6), 1, %s559_s11  }
  0x22   : > { %s333_s2 = sshll.u32 (%p643_p6), %s634_s19, 1  ;;  %s332_s3 = sshll.u32 (%p643_p6), %s107_s30, 2 }
  0x23   : > { %s115_s4 = ssub.s32 (%p643_p6), 3, %s333_s2  ;;  %s684_s15 = scalar_lea.sflag (%p643_p6), [#allocation3], %s107_s30 }
  0x24   : > { %p116_p4 = scmp.lt.s32.totalorder (%p643_p6), %s115_s4, 2  ;;  %s111_s16 = scalar_lea.vmem (%p643_p6), [#allocation2], %s332_s3 }
  0x28   : > { %s821_s4 = smov (!%p116_p4, %s115_s4), 2 }
  0x29   : > { %s681_s5 = sshll.u32 %s821_s4, 5 }
  0x2a   : > { %s120_s9 = ssub.s32 64, %s681_s5 }
  0x2b   : > { %121 = vsyncadd %s684_s15, %s120_s9  ;;  %p335_p5 = scmp.ne.s32.totalorder %s681_s5, 0  ;;  %s356_s18 = sshll.u32 %s634_s19, 6 }
  0x2c   : > { %s692_s23 = scalar_lea.hbm %s798_s0, %s356_s18  ;;  %s129_s24 = sshll.u32 %s111_s16, 4  ;;  %s130_s24 = int_to_ptr.vmem [resolvable:$true] %s129_s24 }
  0x2d   : > { %s437_s25 = scalar_lea.hbm %s692_s23, %s681_s5  ;;  %s441_s19 = scalar_lea.hbm %s798_s0, 96 }
  0x2e   : > { %p438_p6 = scmp.ne.s32.totalorder %s692_s23, %s437_s25  ;;  %p442_p10 = scmp.lt.u32.totalorder %s692_s23, %s798_s0 }
  0x2f   : > { %p443_p11 = scmp.lt.u32.totalorder %s441_s19, %s437_s25  ;;  %p445_p13 = scmp.lt.u32.totalorder %s437_s25, %s692_s23 }
  0x30   : > { %p439_p7 = pnand %p438_p6, %p335_p5 }
  0x31   : > { %p444_p12 = por %p443_p11, %p442_p10 }
  0x32   : > { %p440_p9 = pneg %p439_p7 }
  0x33   : > { %p446_p0 = por %p445_p13, %p444_p12 }
  0x35   : > { %p447_p4 = pnand %p446_p0, %p440_p9 }
  0x37   : > { %450 = shalt.err (!%p447_p4)
}
  0x38   : > { %s451_s9 = scalar_lea.vmem %s130_s24, %s681_s5  ;;  %s573_s16 = smov [#allocation2]  }
  0x39   : > { %p452_p3 = scmp.ne.s32.totalorder %s130_s24, %s451_s9  ;;  %s455_s18 = sshll.u32 %s573_s16, 4  ;;  %s456_s18 = int_to_ptr.vmem [resolvable:$false] %s455_s18 }
  0x3a   : > { %s457_s20 = scalar_lea.vmem %s456_s18, 128  ;;  %p458_p2 = scmp.lt.s32.totalorder %s130_s24, %s456_s18 }
  0x3b   : > { %p453_p6 = pnand %p452_p3, %p335_p5  ;;  %p459_p1 = scmp.lt.s32.totalorder %s457_s20, %s451_s9 }
  0x3d   : > { %p454_p7 = pneg %p453_p6  ;;  %p460_p8 = por %p459_p1, %p458_p2 }
  0x3f   : > { %p461_p10 = pnand %p460_p8, %p454_p7 }
  0x41   : > { %464 = shalt.err (!%p461_p10)
}
  0x42   : > { %132 = dma.hbm_to_vmem [thread:$0]  (%p335_p5), %s692_s23, %s681_s5, %s130_s24, %s684_s15  }
  0x43 PF: > { %p339_p3 = scmp.ge.s32.totalorder %s571_s14, 1  ;;  %p134_p9 = scmp.lt.s32.totalorder %s571_s14, 3 }
  0x45   : > { %p135_p11 = pnand %p339_p3, %p134_p9 }
  0x46   : > { %s140_s21 = sand.u32 (!%p135_p11), 1, %s555_s10   ;;  %p806_p8 = scmp.ne.s32.totalorder (!%p135_p11), %s803_s22, 0 }
  0x47   : > { %138 = sbr.rel (%p135_p11) target bundleno = 140 (0x8c), region = 24  ;;  %s340_s25 = sshll.u32 (!%p135_p11), %s140_s21, 2 }
  0x48   : > { %s141_s30 = scalar_lea.sflag (!%p135_p11), [#allocation3], %s140_s21  ;;  %s144_s2 = scalar_lea.vmem (!%p135_p11), [#allocation2], %s340_s25 }
  0x4e   : > { %530 = dma.done.wait (%p806_p8), %s141_s30, 64  }
  0x4f   : > { %532 = vsyncadd (%p806_p8), %s141_s30, 4294967232  ;;  %s160_s5 = sand.u32 1, %s543_s7   ;;  %s342_s15 = sshll.u32 %s563_s12, 8 }
  0x50   : > { %s341_s23 = sshll.u32 %s160_s5, 2  ;;  %s176_s24 = sadd.s32 256, %s342_s15 }
  0x51   : > { %s724_s19 = scalar_lea.vmem [#allocation5], %s341_s23  ;;  %p343_p1 = scmp.gt.s32.totalorder %s176_s24, 288 }
  0x52   : > { %v181_v0 = vld [vmem:[%s144_s2] sm:$0xf] (!%p343_p1) }
  0x53   : > { %180 = sbr.rel (%p343_p1) target bundleno = 90 (0x5a), region = 32  ;;  %182 = vst [vmem:[%s724_s19] sm:$0xf] (!%p343_p1), %v181_v0 }
  0x5a PF: > { %p344_p2 = scmp.le.s32.totalorder %s176_s24, 288 }
  0x5b   : > { %v187_v1 = vlaneseq (!%p344_p2)  ;;  %v190_v2 = vstv (!%p344_p2), %s342_s15  ;;  %v345_v4 = vld.sshfl [vmem:[%s144_s2] sm:$0x33 pattern:$0x76325410] (!%p344_p2) }
  0x5c   : > { %186 = sbr.rel (%p344_p2) target bundleno = 104 (0x68), region = 36  ;;  %v204_v7 = vcombine.high (!%p344_p2), %v345_v4, %v345_v4 }
  0x5d   : > { %v188_v3 = vand.u32 (!%p344_p2), 127, %v187_v1 }
  0x5f   : > { %v189_v5 = vadd.s32 (!%p344_p2), 128, %v188_v3  ;;  %v191_v6 = vadd.s32 (!%p344_p2), %v190_v2, %v188_v3 }
  0x61   : > { %v192_v8 = vadd.s32 (!%p344_p2), %v190_v2, %v189_v5  ;;  %vm193_vm0 = vcmp.lt.s32.totalorder (!%p344_p2), %v191_v6, 288 }
  0x62   : > { %v207_v9 = vsel (!%p344_p2), %vm193_vm0, %v345_v4, 0.0 }
  0x63   : > { %vm194_vm1 = vcmp.lt.s32.totalorder %v192_v8, 288 }
  0x64   : > { %v208_v10 = vsel %vm194_vm1, %v204_v7, 0.0 }
  0x65   : > { %v211_v11 = vcombine.low %v207_v9, %v208_v10 }
  0x67   : > { %346 = vst.sshfl [vmem:[%s724_s19] sm:$0x33 pattern:$0x76325410] %v211_v11 }
  0x68 PF: > { %s728_s22 = scalar_lea.sflag [#allocation4], %s160_s5  ;;  %p807_p5 = scmp.ne.s32.totalorder %s804_s28, 0 }
  0x69   : > { %s348_s3 = sshll.u32 (%p807_p5), %s563_s12, 1 }
  0x6a   : > { %228 = sbr.rel (!%p807_p5) target bundleno = 140 (0x8c), region = 40  ;;  %s230_s4 = ssub.s32 (%p807_p5), 3, %s348_s3 }
  0x6b   : > { %p231_p12 = scmp.lt.s32.totalorder (%p807_p5), %s230_s4, 2 }
  0x71   : > { %s823_s4 = smov (!%p231_p12, %s230_s4), 2 }
  0x72   : > { %s733_s9 = sshll.u32 %s823_s4, 5 }
  0x73   : > { %s235_s16 = ssub.s32 64, %s733_s9 }
  0x74   : > { %236 = vsyncadd %s728_s22, %s235_s16  ;;  %p350_p13 = scmp.ne.s32.totalorder %s733_s9, 0  ;;  %s357_s18 = sshll.u32 %s563_s12, 6 }
  0x75   : > { %s742_s21 = scalar_lea.hbm %s799_s1, %s357_s18  ;;  %s244_s25 = sshll.u32 %s724_s19, 4  ;;  %s245_s25 = int_to_ptr.vmem [resolvable:$true] %s244_s25 }
  0x76   : > { %s465_s30 = scalar_lea.vmem %s245_s25, %s733_s9  ;;  %s574_s2 = smov [#allocation5]  }
  0x77   : > { %p466_p0 = scmp.ne.s32.totalorder %s245_s25, %s465_s30  ;;  %s469_s5 = sshll.u32 %s574_s2, 4  ;;  %s470_s5 = int_to_ptr.vmem [resolvable:$false] %s469_s5 }
  0x78   : > { %s471_s15 = scalar_lea.vmem %s470_s5, 128  ;;  %p472_p7 = scmp.lt.s32.totalorder %s245_s25, %s470_s5 }
  0x79   : > { %p467_p4 = pnand %p466_p0, %p350_p13  ;;  %p473_p10 = scmp.lt.s32.totalorder %s471_s15, %s465_s30 }
  0x7b   : > { %p468_p6 = pneg %p467_p4  ;;  %p474_p3 = por %p473_p10, %p472_p7 }
  0x7d   : > { %p475_p9 = pnand %p474_p3, %p468_p6 }
  0x7f   : > { %478 = shalt.err (!%p475_p9)
}
  0x80   : > { %s479_s12 = scalar_lea.hbm %s742_s21, %s733_s9  ;;  %s483_s19 = scalar_lea.hbm %s799_s1, 96 }
  0x81   : > { %p480_p11 = scmp.ne.s32.totalorder %s742_s21, %s479_s12  ;;  %p484_p2 = scmp.lt.u32.totalorder %s742_s21, %s799_s1 }
  0x82   : > { %p485_p5 = scmp.lt.u32.totalorder %s483_s19, %s479_s12  ;;  %p487_p0 = scmp.lt.u32.totalorder %s479_s12, %s742_s21 }
  0x83   : > { %p481_p8 = pnand %p480_p11, %p350_p13 }
  0x84   : > { %p486_p12 = por %p485_p5, %p484_p2 }
  0x85   : > { %p482_p1 = pneg %p481_p8 }
  0x86   : > { %p488_p4 = por %p487_p0, %p486_p12 }
  0x88   : > { %p489_p6 = pnand %p488_p4, %p482_p1 }
  0x8a   : > { %492 = shalt.err (!%p489_p6)
}
  0x8b   : > { %247 = dma.vmem_to_hbm [thread:$0]  (%p350_p13), %s245_s25, %s733_s9, %s742_s21, %s728_s22  }
  0x8c PF: > { %s256_s16 = sand.u32 1, %s539_s6   ;;  %p808_p7 = scmp.ne.s32.totalorder %s805_s29, 0 }
  0x8d   : > { %p809_p10 = scmp.ge.s32.totalorder %s571_s14, 2  ;;  %s257_s18 = scalar_lea.sflag [#allocation4], %s256_s16 }
  0x8f   : > { %p361_p3 = pnand %p809_p10, %p808_p7 }
  0x91   : > { %534 = dma.done.wait (!%p361_p3), %s257_s18, 64  }
  0x92   : > { %536 = vsyncadd (!%p361_p3), %s257_s18, 4294967232  ;;  %s17_s14 = sadd.s32 1, %s571_s14   ;;  %s810_s6 = smov %s543_s7 }
  0x93   : > { %p14_p9 = scmp.ge.s32.totalorder %s17_s14, 4   ;;  %s811_s7 = smov %s547_s8 }
  0x94   : > { %s812_s8 = smov %s657_s26  ;;  %s813_s9 = smov %s555_s10 }
  0x95   : > { %s814_s10 = smov %s559_s11  ;;  %s815_s11 = smov %s660_s27 }
  0x96   : > { %s816_s12 = smov %s567_s13  ;;  %s817_s13 = smov %s819_s17 }
  0x97   :  { %16 = sbr.rel (!%p14_p9) target bundleno = 8 (0x8), region = 77 }
  0x9e   :  { %262 = vsyncpa [#allocation3], 1 }
  0x9f   :  { %264 = vsyncpa [#allocation3 + $0x1], 1 }
  0xa0   :  { %265 = vsyncpa [#allocation4], 1 }
  0xa1   :  { %267 = vsyncpa [#allocation4 + $0x1], 1 }

</bundles_post_ra>
